<compile_context>
chip_gen: v5e
topology: v5e:2x2
jax: 0.10.0
libtpu: 0.0.40
codegen_flags: <defaults>
</compile_context>

<pallas_src>
import jax
import jax.numpy as jnp
from jax.experimental import pallas as pl
from jax.experimental.pallas import tpu as pltpu


def posterize_kernel(shift_ref, x_ref, o_ref):
    # shift_ref: SMEM (1,) int32; scalar tanh/shift math is hoisted to the wrapper
    # (fused by jit; the per-element stream below is the only HBM traffic).
    s = shift_ref[0]
    x = x_ref[...].astype(jnp.float32)
    v = (x * 255.0).astype(jnp.int32)                 # matches torch .long() (trunc toward 0)
    v = jnp.right_shift(jnp.left_shift(v, s), s)      # (v << shift) >> shift, faithful to spec
    y = v.astype(jnp.float32) * (1.0 / 255.0)
    o_ref[...] = jnp.clip(y, 0.0, 1.0).astype(o_ref.dtype)


def _round_up(a, b):
    return pl.cdiv(a, b) * b


def posterize_forward(x, p, *, max_lane=1024, max_tile_rows=1024):
    """x: (B, C, H, W) float in [0,1]; p: (1,) float32 raw parameter."""
    orig_shape = x.shape
    dtype = x.dtype
    total = int(x.size)
    itemsize = int(jnp.dtype(dtype).itemsize)

    # Hoisted scalar path: mag = (tanh(p)+1)/2, shift = int((1-mag)*8).
    mag = (jnp.tanh(p.astype(jnp.float32)) + 1.0) * 0.5
    shift = jnp.floor((1.0 - mag) * 8.0).astype(jnp.int32).reshape(1)

    # Lane-dense slab: wide last dim (multiple of 128). Pad only to a lane multiple.
    lane = int(min(max_lane, 128 * pl.cdiv(total, 128)))
    rows = int(pl.cdiv(total, lane))

    # Sublane packing multiple for the native dtype: f32 -> 8, bf16 -> 16, int8 -> 32.
    sub = int(8 * max(1, 4 // itemsize))

    if rows <= sub:
        tile_rows = rows                      # single full-extent block (allowed)
    else:
        # >= 2 grid steps when there's enough work (v7x megacore), capped at
        # max_tile_rows (~4 MiB f32 tiles: amortizes grid-step overhead, v7x-friendly).
        tile_rows = int(min(max_tile_rows, _round_up(pl.cdiv(rows, 2), sub)))
    grid_steps = int(pl.cdiv(rows, tile_rows))

    padded = rows * lane
    x_flat = x.reshape(-1)
    if padded != total:
        x_flat = jnp.pad(x_flat, (0, padded - total))
    x2 = x_flat.reshape(rows, lane)

    # ~2 in + 2 out double buffers of one tile plus headroom; <= 32 MiB (v7x safe).
    tile_bytes = tile_rows * lane * itemsize
    vmem_limit = int(min(32 * 1024 * 1024,
                         max(8 * 1024 * 1024, 4 * tile_bytes + (2 << 20))))

    out = pl.pallas_call(
        posterize_kernel,
        out_shape=jax.ShapeDtypeStruct((rows, lane), dtype),
        grid=(grid_steps,),
        in_specs=[
            pl.BlockSpec(memory_space=pltpu.SMEM),              # shift scalar
            pl.BlockSpec((tile_rows, lane), lambda i: (i, 0)),  # x tile
        ],
        out_specs=pl.BlockSpec((tile_rows, lane), lambda i: (i, 0)),
        compiler_params=pltpu.CompilerParams(
            dimension_semantics=("parallel",),
            vmem_limit_bytes=vmem_limit,
        ),
    )(shift, x2)

    out_flat = out.reshape(-1)
    if padded != total:
        out_flat = out_flat[:total]
    return out_flat.reshape(orig_shape)


def posterize_reference(x, p):
    mag = (jnp.tanh(p.astype(jnp.float32)) + 1.0) * 0.5
    mag = mag.reshape(-1, 1, 1, 1)
    shift = jnp.floor((1.0 - mag) * 8.0).astype(jnp.int32)
    v = (x.astype(jnp.float32) * 255.0).astype(jnp.int32)
    v = jnp.right_shift(jnp.left_shift(v, shift), shift)
    return jnp.clip(v.astype(jnp.float32) * (1.0 / 255.0), 0.0, 1.0).astype(x.dtype)


if __name__ == "__main__":
    key = jax.random.PRNGKey(0)
    kx, kp = jax.random.split(key)

    # PosterizeLayer.__init__: self.params = nn.Parameter(torch.rand(1))
    p = jax.random.uniform(kp, (1,), dtype=jnp.float32)

    # Small NCHW image batch in [0, 1]
    x = jax.random.uniform(kx, (2, 4, 16, 16), dtype=jnp.float32)

    # jit the wrapper so the (rare, tiny) pad/slice/reshape plumbing fuses with the call.
    fwd = jax.jit(posterize_forward)
    out = fwd(x, p)
    out = jax.block_until_ready(out)

    ref = posterize_reference(x, p)
    assert out.shape == x.shape and out.dtype == x.dtype
    assert jnp.allclose(out, ref, atol=1e-6), "mismatch vs reference"

    # TODO(synk): eval-mode branch (torchvision RandomPosterize) is not part of the
    # training forward pass and is not implemented here.
    print("KERNEL_OK")
</pallas_src>

<mosaic_0001>
module attributes {stable_mosaic.version = 11 : i64} {
  func.func @posterize_kernel(%arg0: i32, %arg1: memref<1xi32, #tpu.memory_space<smem>>, %arg2: memref<2x1024xf32, #tpu.memory_space<vmem>>, %arg3: memref<2x1024xf32, #tpu.memory_space<vmem>>) attributes {dimension_semantics = [#tpu.dimension_semantics<parallel>], iteration_bounds = array<i64: 1>, scalar_prefetch = 0 : i64, scratch_operands = 0 : i64, tpu.core_type = #tpu.core_type<tc>, window_params = [{transform_indices = @transform_0, window_bounds = array<i64: 1>}, {transform_indices = @transform_1, window_bounds = array<i64: 2, 1024>}, {transform_indices = @transform_2, window_bounds = array<i64: 2, 1024>}]} {
    %c0 = arith.constant 0 : index
    %0 = memref.load %arg1[%c0] : memref<1xi32, #tpu.memory_space<smem>>
    %c0_0 = arith.constant 0 : index
    %c0_1 = arith.constant 0 : index
    %1 = vector.load %arg2[%c0_0, %c0_1] : memref<2x1024xf32, #tpu.memory_space<vmem>>, vector<2x1024xf32>
    %cst = arith.constant 2.550000e+02 : f32
    %2 = vector.broadcast %cst : f32 to vector<2x1024xf32>
    %3 = arith.mulf %1, %2 : vector<2x1024xf32>
    %4 = arith.fptosi %3 : vector<2x1024xf32> to vector<2x1024xi32>
    %5 = vector.broadcast %0 : i32 to vector<2x1024xi32>
    %6 = arith.shli %4, %5 : vector<2x1024xi32>
    %7 = vector.broadcast %0 : i32 to vector<2x1024xi32>
    %8 = arith.shrsi %6, %7 : vector<2x1024xi32>
    %9 = arith.sitofp %8 : vector<2x1024xi32> to vector<2x1024xf32>
    %cst_2 = arith.constant 0.00392156886 : f32
    %10 = vector.broadcast %cst_2 : f32 to vector<2x1024xf32>
    %11 = arith.mulf %9, %10 : vector<2x1024xf32>
    %cst_3 = arith.constant 0.000000e+00 : f32
    %cst_4 = arith.constant 1.000000e+00 : f32
    %12 = vector.broadcast %cst_3 : f32 to vector<2x1024xf32>
    %13 = arith.maximumf %12, %11 : vector<2x1024xf32>
    %14 = vector.broadcast %cst_4 : f32 to vector<2x1024xf32>
    %15 = arith.minimumf %14, %13 : vector<2x1024xf32>
    %c0_5 = arith.constant 0 : index
    %c0_6 = arith.constant 0 : index
    %16 = vector.load %arg3[%c0_5, %c0_6] : memref<2x1024xf32, #tpu.memory_space<vmem>>, vector<2x1024xf32>
    tpu.vector_store %arg3[%c0_5, %c0_6], %15 {strides = array<i32>} : memref<2x1024xf32, #tpu.memory_space<vmem>>, vector<2x1024xf32>,
    return
  }
  func.func @transform_0(%arg0: i32) -> i32 {
    %c0_i32 = arith.constant 0 : i32
    %c0_i32_0 = arith.constant 0 : i32
    return %c0_i32 : i32
  }
  func.func @transform_1(%arg0: i32) -> (i32, i32) {
    %c0_i32 = arith.constant 0 : i32
    %c0_i32_0 = arith.constant 0 : i32
    return %arg0, %c0_i32 : i32, i32
  }
  func.func @transform_2(%arg0: i32) -> (i32, i32) {
    %c0_i32 = arith.constant 0 : i32
    %c0_i32_0 = arith.constant 0 : i32
    return %arg0, %c0_i32 : i32, i32
  }
}

</mosaic_0001>

<bundles_post_ra>
// kernel: posterize_forward.1
= control target key start
LH: loop header
LB: loop body
LE: loop exit
PB: predicated region body
PF: predicated region fallthrough
CT: control target
= control target key end

     0   :  { %s78_s1 = inlined_call_operand.vmem [shape: f32[2,1024], index: 1, kind: input, shape index: {}]   ;;  %s79_s0 = inlined_call_operand.<no memory space> [shape: s32[1], index: 0, kind: input, shape index: {}]   ;;  %s80_s2 = inlined_call_operand.vmem [shape: f32[2,1024], index: 2, kind: output, shape index: {}]  }
   0x1   :  { %v13_v0 = vld [vmem:[%s78_s1] sm:$0xff]  ;;  %v14_v1 = vld [vmem:[%s78_s1 + $0x8] sm:$0xff]  ;;  %v19_v9 = vstv %s79_s0 }
   0x2   :  { %v15_v2 = vmul.f32 255.0, %v13_v0  ;;  %v16_v3 = vmul.f32 255.0, %v14_v1 }
   0x4   :  { %vm38_vm0 = vcmp.lt.s32.totalorder %v15_v2, 0  ;;  %v39_v4 = vceil.f32 %v15_v2  ;;  %v40_v5 = vfloor.f32 %v15_v2  ;;  %vm43_vm1 = vcmp.lt.s32.totalorder %v16_v3, 0 }
   0x5   :  { %v44_v6 = vceil.f32 %v16_v3  ;;  %v45_v7 = vfloor.f32 %v16_v3 }
   0x6   :  { %v41_v8 = vsel %vm38_vm0, %v39_v4, %v40_v5 }
   0x7   :  { %v42_v10 = vcvt.f32.s32 %v41_v8  ;;  %v46_v11 = vsel %vm43_vm1, %v44_v6, %v45_v7 }
   0x8   :  { %v47_v12 = vcvt.f32.s32 %v46_v11 }
   0x9   :  { %v20_v13 = vshll.u32 %v42_v10, %v19_v9 }
   0xa   :  { %v21_v14 = vshll.u32 %v47_v12, %v19_v9 }
   0xb   :  { %v22_v15 = vshra.s32 %v20_v13, %v19_v9 }
   0xc   :  { %v23_v16 = vshra.s32 %v21_v14, %v19_v9 }
   0xd   :  { %v24_v17 = vcvt.s32.f32 %v22_v15 }
   0xe   :  { %v25_v18 = vcvt.s32.f32 %v23_v16 }
   0xf   :  { %v26_v19 = vmul.f32 0.003921569, %v24_v17 }
  0x10   :  { %v27_v20 = vmul.f32 0.003921569, %v25_v18 }
  0x11   :  { %v28_v21 = vmax.f32 %v26_v19, 0.0 }
  0x12   :  { %v29_v22 = vmax.f32 %v27_v20, 0.0 }
  0x13   :  { %v30_v23 = vmin.f32 %v28_v21, 1.0 }
  0x14   :  { %v31_v24 = vmin.f32 %v29_v22, 1.0 }
  0x15   :  { %32 = vst [vmem:[%s80_s2] sm:$0xff] %v30_v23 }
  0x16   :  { %33 = vst [vmem:[%s80_s2 + $0x8] sm:$0xff] %v31_v24 }

</bundles_post_ra>
